<compile_context>
chip_gen: v7x
topology: tpu7x:2x2x1
jax: 0.10.0
libtpu: 0.0.40
codegen_flags: <defaults>
</compile_context>

<pallas_src>
import functools
import math

import jax
import jax.numpy as jnp
from jax.experimental import pallas as pl
from jax.experimental.pallas import tpu as pltpu


_LANES = 128
_BLOCK_BYTES_F32 = 4 * 1024 * 1024     # ~4 MiB input block (4-byte dtypes)
_BLOCK_BYTES_SMALL = 2 * 1024 * 1024   # ~2 MiB block (2-byte dtypes / folded path)
_MAX_ROW_TILE = 8192                   # sublane-extent cap
_VMEM_LIMIT_BYTES = 48 * 1024 * 1024   # < v7x's 64 MiB per-TC VMEM


def _ln_kernel(x_ref, scale_ref, shift_ref, o_ref, *, eps):
    """fold == 1: normalize over the full lane axis (d_block == emb_dim)."""
    x = x_ref[...].astype(jnp.float32)
    scale = scale_ref[...].astype(jnp.float32)   # (1, d), broadcasts over rows
    shift = shift_ref[...].astype(jnp.float32)

    mean = jnp.mean(x, axis=-1, keepdims=True)
    centered = x - mean
    var = jnp.mean(centered * centered, axis=-1, keepdims=True)  # correction=0
    inv_std = jax.lax.rsqrt(var + eps)
    o_ref[...] = (scale * (centered * inv_std) + shift).astype(o_ref.dtype)


def _ln_fold_kernel(x_ref, scale_ref, shift_ref, bmat_ref, o_ref, *, eps):
    """fold > 1: each 128-lane row packs `fold` independent rows of emb_dim lanes.

    bmat is a block-diagonal (128,128) matrix pre-scaled by 1/emb_dim, so
    x @ bmat broadcasts each segment's mean back across that segment's lanes
    in one MXU matmul (the MXU is otherwise idle in this kernel).
    Stats use E[x^2] - mean^2 so the two matmuls are independent; clamped at 0.
    Note: slight cancellation for data with |mean| >> std (validated on
    zero-mean data against the two-pass reference).
    """
    x = x_ref[...].astype(jnp.float32)
    scale = scale_ref[...].astype(jnp.float32)
    shift = shift_ref[...].astype(jnp.float32)
    b = bmat_ref[...]                      # (128, 128), pre-scaled by 1/emb_dim
    mm_dtype = b.dtype                     # bf16 for bf16 inputs, f32 otherwise

    xm = x_ref[...].astype(mm_dtype)
    mean = jnp.dot(xm, b, preferred_element_type=jnp.float32)
    xsq = (x * x).astype(mm_dtype)
    meansq = jnp.dot(xsq, b, preferred_element_type=jnp.float32)

    var = jnp.maximum(meansq - mean * mean, 0.0)
    inv_std = jax.lax.rsqrt(var + eps)
    o_ref[...] = (scale * ((x - mean) * inv_std) + shift).astype(o_ref.dtype)


def layer_norm(x: jax.Array, scale: jax.Array, shift: jax.Array,
               eps: float = 1e-5) -> jax.Array:
    """LayerNorm over the last axis of x. scale/shift have shape (emb_dim,)."""
    orig_shape = x.shape
    d = orig_shape[-1]
    rows = int(math.prod(orig_shape[:-1])) if len(orig_shape) > 1 else 1
    dtype = x.dtype
    itemsize = jnp.dtype(dtype).itemsize

    # Fold several small rows into the 128-lane axis when it is free (divisor
    # of 128 and rows divide evenly, so no padding copy is ever needed).
    fold = _LANES // d if (d < _LANES and _LANES % d == 0) else 1
    if fold > 1 and rows % fold != 0:
        # TODO(synk): handle the <= fold-1 remainder rows with a tiny second
        # pallas_call instead of dropping to the unfolded (lane-sparse) path.
        fold = 1
    # TODO(synk): lane-sparse emb_dim (e.g. 48, 96, 320) still uses masked
    # partial stores; packing those lane-dense needs a layout change upstream.

    x2d = x.reshape(rows, d)
    scale_row = scale.reshape(1, d)
    shift_row = shift.reshape(1, d)

    if fold > 1:
        x2d = x2d.reshape(rows // fold, fold * d)   # free, row-major contiguous
        scale_row = jnp.tile(scale_row, (1, fold))
        shift_row = jnp.tile(shift_row, (1, fold))

    work_rows, d_block = x2d.shape

    # Row tile: VMEM-budgeted, multiple of the sublane packing, >= 2 grid steps
    # whenever possible so v7x can shard across both TensorCores.
    sub = 16 if itemsize == 2 else 8
    if work_rows <= sub:
        rt = work_rows                                 # block == full row extent
    else:
        target = _BLOCK_BYTES_SMALL if (itemsize == 2 or fold > 1) else _BLOCK_BYTES_F32
        rt = target // max(1, d_block * itemsize)
        rt = max(sub, min(rt, _MAX_ROW_TILE))
        rt = (rt // sub) * sub
        rt = min(rt, pl.cdiv(work_rows, sub) * sub)    # no pointlessly huge block
        half = pl.cdiv(pl.cdiv(work_rows, 2), sub) * sub
        rt = min(rt, max(sub, half))                   # >= 2 grid steps
    grid = (pl.cdiv(work_rows, rt),)

    in_specs = [
        pl.BlockSpec((rt, d_block), lambda i: (i, 0)),
        pl.BlockSpec((1, d_block), lambda i: (0, 0)),
        pl.BlockSpec((1, d_block), lambda i: (0, 0)),
    ]
    args = [x2d, scale_row, shift_row]

    if fold > 1:
        # bf16 matmul operands only when the input is already bf16; f32 inputs
        # keep f32 matmuls to preserve accuracy (1/d is exact: d divides 128).
        mm_dtype = jnp.bfloat16 if dtype == jnp.bfloat16 else jnp.float32
        li = jax.lax.broadcasted_iota(jnp.int32, (d_block, d_block), 0)
        lj = jax.lax.broadcasted_iota(jnp.int32, (d_block, d_block), 1)
        bmat = ((li // d == lj // d).astype(jnp.float32) / float(d)).astype(mm_dtype)
        in_specs.append(pl.BlockSpec((d_block, d_block), lambda i: (0, 0)))
        args.append(bmat)
        kernel = functools.partial(_ln_fold_kernel, eps=eps)
    else:
        kernel = functools.partial(_ln_kernel, eps=eps)

    mm_flops = (4 * work_rows * d_block * d_block) if fold > 1 else 0
    cost = pl.CostEstimate(
        flops=7 * rows * d + mm_flops,
        transcendentals=rows,
        bytes_accessed=2 * rows * d * itemsize,
    )

    out = pl.pallas_call(
        kernel,
        out_shape=jax.ShapeDtypeStruct((work_rows, d_block), dtype),
        grid_spec=pltpu.PrefetchScalarGridSpec(
            num_scalar_prefetch=0,
            grid=grid,
            in_specs=in_specs,
            out_specs=pl.BlockSpec((rt, d_block), lambda i: (i, 0)),
        ),
        compiler_params=pltpu.CompilerParams(
            dimension_semantics=("parallel",),   # shard grid over v7x's 2 TCs
            vmem_limit_bytes=_VMEM_LIMIT_BYTES,
        ),
        cost_estimate=cost,
    )(*args)

    # Both the fold reshape and this un-reshape are contiguous (no copies).
    return out.reshape(orig_shape)


def _reference(x, scale, shift, eps=1e-5):
    mean = jnp.mean(x, axis=-1, keepdims=True)
    var = jnp.mean((x - mean) ** 2, axis=-1, keepdims=True)
    return scale * ((x - mean) / jnp.sqrt(var + eps)) + shift


if __name__ == "__main__":
    # Module: LayerNorm(emb_dim) — scale = ones(emb_dim), shift = zeros(emb_dim)
    batch, seq, emb_dim = 2, 8, 32

    key = jax.random.PRNGKey(0)
    x = jax.random.normal(key, (batch, seq, emb_dim), dtype=jnp.float32)
    scale = jnp.ones((emb_dim,), dtype=jnp.float32)
    shift = jnp.zeros((emb_dim,), dtype=jnp.float32)

    y = jax.block_until_ready(layer_norm(x, scale, shift))
    assert jnp.allclose(y, _reference(x, scale, shift), atol=1e-5, rtol=1e-5), \
        "mismatch vs reference (folded path)"

    # fold==1 path with a non-divisible row count (ragged trailing block).
    x2 = jax.random.normal(jax.random.PRNGKey(0), (3, 5, 256), dtype=jnp.float32)
    s2 = jnp.ones((256,), jnp.float32)
    b2 = jnp.zeros((256,), jnp.float32)
    y2 = jax.block_until_ready(layer_norm(x2, s2, b2))
    assert jnp.allclose(y2, _reference(x2, s2, b2), atol=1e-5, rtol=1e-5), \
        "mismatch vs reference (unfolded path, ragged rows)"

    # small-d with rows % fold != 0 -> unfolded fallback, lane-sparse stores.
    x3 = jax.random.normal(jax.random.PRNGKey(0), (1, 5, 32), dtype=jnp.float32)
    s3 = jnp.ones((32,), jnp.float32)
    b3 = jnp.zeros((32,), jnp.float32)
    y3 = jax.block_until_ready(layer_norm(x3, s3, b3))
    assert jnp.allclose(y3, _reference(x3, s3, b3), atol=1e-5, rtol=1e-5), \
        "mismatch vs reference (small-d fallback path)"

    print("KERNEL_OK")
</pallas_src>

<mosaic_0001>
module attributes {stable_mosaic.version = 11 : i64} {
  func.func @_ln_fold_kernel(%arg0: i32, %arg1: memref<4x128xf32, #tpu.memory_space<vmem>>, %arg2: memref<1x128xf32, #tpu.memory_space<vmem>>, %arg3: memref<1x128xf32, #tpu.memory_space<vmem>>, %arg4: memref<128x128xf32, #tpu.memory_space<vmem>>, %arg5: memref<4x128xf32, #tpu.memory_space<vmem>>) attributes {dimension_semantics = [#tpu.dimension_semantics<parallel>], iteration_bounds = array<i64: 1>, scalar_prefetch = 0 : i64, scratch_operands = 0 : i64, tpu.core_type = #tpu.core_type<tc>, window_params = [{transform_indices = @transform_0, window_bounds = array<i64: 4, 128>}, {pipeline_mode = #tpu.pipeline_mode<synchronous>, transform_indices = @transform_1, window_bounds = array<i64: 1, 128>}, {pipeline_mode = #tpu.pipeline_mode<synchronous>, transform_indices = @transform_2, window_bounds = array<i64: 1, 128>}, {pipeline_mode = #tpu.pipeline_mode<synchronous>, transform_indices = @transform_3, window_bounds = array<i64: 128, 128>}, {transform_indices = @transform_4, window_bounds = array<i64: 4, 128>}]} {
    %c0 = arith.constant 0 : index
    %c0_0 = arith.constant 0 : index
    %0 = vector.load %arg1[%c0, %c0_0] : memref<4x128xf32, #tpu.memory_space<vmem>>, vector<4x128xf32>
    %c0_1 = arith.constant 0 : index
    %c0_2 = arith.constant 0 : index
    %1 = vector.load %arg2[%c0_1, %c0_2] : memref<1x128xf32, #tpu.memory_space<vmem>>, vector<1x128xf32>
    %c0_3 = arith.constant 0 : index
    %c0_4 = arith.constant 0 : index
    %2 = vector.load %arg3[%c0_3, %c0_4] : memref<1x128xf32, #tpu.memory_space<vmem>>, vector<1x128xf32>
    %c0_5 = arith.constant 0 : index
    %c0_6 = arith.constant 0 : index
    %3 = vector.load %arg4[%c0_5, %c0_6] : memref<128x128xf32, #tpu.memory_space<vmem>>, vector<128x128xf32>
    %c0_7 = arith.constant 0 : index
    %c0_8 = arith.constant 0 : index
    %4 = vector.load %arg1[%c0_7, %c0_8] : memref<4x128xf32, #tpu.memory_space<vmem>>, vector<4x128xf32>
    %cst = arith.constant dense<0.000000e+00> : vector<4x128xf32>
    %5 = tpu.matmul %4, %3, %cst {dimension_numbers = #tpu.dot_dimension_numbers<[1], [0], [0], [1], [0, 0, 1, 1], [], []>} : vector<4x128xf32>, vector<128x128xf32>, vector<4x128xf32> -> vector<4x128xf32>
    %6 = arith.mulf %0, %0 : vector<4x128xf32>
    %cst_9 = arith.constant dense<0.000000e+00> : vector<4x128xf32>
    %7 = tpu.matmul %6, %3, %cst_9 {dimension_numbers = #tpu.dot_dimension_numbers<[1], [0], [0], [1], [0, 0, 1, 1], [], []>} : vector<4x128xf32>, vector<128x128xf32>, vector<4x128xf32> -> vector<4x128xf32>
    %8 = arith.mulf %5, %5 : vector<4x128xf32>
    %9 = arith.subf %7, %8 : vector<4x128xf32>
    %cst_10 = arith.constant 0.000000e+00 : f32
    %10 = vector.broadcast %cst_10 : f32 to vector<4x128xf32>
    %11 = arith.maximumf %9, %10 : vector<4x128xf32>
    %cst_11 = arith.constant 9.99999974E-6 : f32
    %12 = vector.broadcast %cst_11 : f32 to vector<4x128xf32>
    %13 = arith.addf %11, %12 : vector<4x128xf32>
    %14 = math.rsqrt %13 : vector<4x128xf32>
    %15 = arith.subf %0, %5 : vector<4x128xf32>
    %16 = arith.mulf %15, %14 : vector<4x128xf32>
    %17 = vector.broadcast %1 : vector<1x128xf32> to vector<4x128xf32>
    %18 = arith.mulf %17, %16 : vector<4x128xf32>
    %19 = vector.broadcast %2 : vector<1x128xf32> to vector<4x128xf32>
    %20 = arith.addf %18, %19 : vector<4x128xf32>
    %c0_12 = arith.constant 0 : index
    %c0_13 = arith.constant 0 : index
    %21 = vector.load %arg5[%c0_12, %c0_13] : memref<4x128xf32, #tpu.memory_space<vmem>>, vector<4x128xf32>
    tpu.vector_store %arg5[%c0_12, %c0_13], %20 {strides = array<i32>} : memref<4x128xf32, #tpu.memory_space<vmem>>, vector<4x128xf32>,
    return
  }
  func.func @transform_0(%arg0: i32) -> (i32, i32) {
    %c0_i32 = arith.constant 0 : i32
    %c0_i32_0 = arith.constant 0 : i32
    return %arg0, %c0_i32 : i32, i32
  }
  func.func @transform_1(%arg0: i32) -> (i32, i32) {
    %c0_i32 = arith.constant 0 : i32
    %c0_i32_0 = arith.constant 0 : i32
    %c0_i32_1 = arith.constant 0 : i32
    return %c0_i32, %c0_i32_0 : i32, i32
  }
  func.func @transform_2(%arg0: i32) -> (i32, i32) {
    %c0_i32 = arith.constant 0 : i32
    %c0_i32_0 = arith.constant 0 : i32
    %c0_i32_1 = arith.constant 0 : i32
    return %c0_i32, %c0_i32_0 : i32, i32
  }
  func.func @transform_3(%arg0: i32) -> (i32, i32) {
    %c0_i32 = arith.constant 0 : i32
    %c0_i32_0 = arith.constant 0 : i32
    %c0_i32_1 = arith.constant 0 : i32
    return %c0_i32, %c0_i32_0 : i32, i32
  }
  func.func @transform_4(%arg0: i32) -> (i32, i32) {
    %c0_i32 = arith.constant 0 : i32
    %c0_i32_0 = arith.constant 0 : i32
    return %arg0, %c0_i32 : i32, i32
  }
}

</mosaic_0001>

<bundles_post_ra>
// kernel: tpu_custom_call.1
= control target key start
LH: loop header
LB: loop body
LE: loop exit
PB: predicated region body
PF: predicated region fallthrough
CT: control target
= control target key end

     0   :  { %9 = vsyncpa [#allocation3], 0  ;;  %s560_s0 = inlined_call_operand.hbm [shape: f32[4,128], index: 0, kind: input, shape index: {}]   ;;  %s561_s1 = inlined_call_operand.vmem [shape: f32[1,128], index: 1, kind: input, shape index: {}]   ;;  %s562_s2 = inlined_call_operand.vmem [shape: f32[1,128], index: 2, kind: input, shape index: {}]   ;;  %s563_s3 = inlined_call_operand.hbm [shape: f32[128,128], index: 3, kind: input, shape index: {}]   ;;  %s564_s4 = inlined_call_operand.hbm [shape: f32[4,128], index: 4, kind: output, shape index: {}]  }
   0x1   :  { %10 = vsyncpa [#allocation6], 0 }
   0x2   :  { %11 = vsyncpa [#allocation4], 0  ;;  %s478_s15 = smov [#allocation2]   ;;  %s479_s17 = smov [#allocation5]  }
   0x3   :  { %s18_s16 = sshll.u32 %s478_s15, 4  ;;  %s31_s18 = sshll.u32 %s479_s17, 4  ;;  %s19_s16 = int_to_ptr.vmem [resolvable:$true] %s18_s16  ;;  %s511_s18 = int_to_ptr.vmem [resolvable:$true] %s31_s18 }
   0x4   :  { %s406_s21 = scalar_lea.hbm %s560_s0, 64 }
   0x5   :  { %p407_p0 = scmp.ne.s32.totalorder %s560_s0, %s406_s21  ;;  %p410_p1 = scmp.lt.u32.totalorder %s406_s21, %s560_s0 }
   0x7   :  { %p412_p2 = pnand %p410_p1, %p407_p0 }
   0x9   :  { %415 = shalt.err (!%p412_p2)
}
   0xa   :  { %s416_s26 = scalar_lea.vmem %s19_s16, 64  ;;  %p421_p4 = scmp.lt.s32.totalorder %s19_s16, %s19_s16 }
   0xb   :  { %p417_p3 = scmp.ne.s32.totalorder %s19_s16, %s416_s26  ;;  %p422_p5 = scmp.lt.s32.totalorder %s416_s26, %s416_s26 }
   0xd   :  { %p423_p6 = por %p422_p5, %p421_p4 }
   0xf   :  { %p424_p7 = pnand %p423_p6, %p417_p3 }
  0x11   :  { %427 = shalt.err (!%p424_p7)
}
  0x12   :  { %21 = dma.hbm_to_vmem [thread:$0]  %s560_s0, 64, %s19_s16, [#allocation3]  }
  0x13   :  { %s428_s5 = scalar_lea.hbm %s563_s3, 2048 }
  0x14   :  { %p429_p8 = scmp.ne.s32.totalorder %s563_s3, %s428_s5  ;;  %p432_p9 = scmp.lt.u32.totalorder %s428_s5, %s563_s3 }
  0x16   :  { %p434_p10 = pnand %p432_p9, %p429_p8 }
  0x18   :  { %437 = shalt.err (!%p434_p10)
}
  0x19   :  { %s438_s10 = scalar_lea.vmem %s511_s18, 2048  ;;  %p443_p12 = scmp.lt.s32.totalorder %s511_s18, %s511_s18 }
  0x1a   :  { %p439_p11 = scmp.ne.s32.totalorder %s511_s18, %s438_s10  ;;  %p444_p13 = scmp.lt.s32.totalorder %s438_s10, %s438_s10 }
  0x1c   :  { %p445_p0 = por %p444_p13, %p443_p12 }
  0x1e   :  { %p446_p1 = pnand %p445_p0, %p439_p11 }
  0x20   :  { %449 = shalt.err (!%p446_p1)
}
  0x21   :  { %s480_s0 = smov 128   ;;  %s481_s11 = smov 8  }
  0x22   :  { %37 = dma.hbm_to_vmem [thread:$0]  %s563_s3, 2048, %s511_s18, [#allocation6], %s480_s0, %s480_s0, %s481_s11  }
  0x23   :  { %472 = dma.done.wait [#allocation3], 64  }
  0x24   :  { %473 = vsyncadd [#allocation3], 4294967232 }
  0x25   :  { %474 = dma.done.wait [#allocation6], 2048  }
  0x26   :  { %475 = vsyncadd [#allocation6], 4294965248  ;;  %v482_v0 = vmov 0.0|0.0   ;;  %vm483_vm0 = vmmov 0   ;;  %v484_v1 = vmov 0.0   ;;  %v47_v2 = vld [vmem:[#allocation5] sm:$0xff] }
  0x27   :  { %348 = vmatprep.subr.bf16.mxu0 %v482_v0  ;;  %372 = vmatprep.subr.bf16.mxu1 %v482_v0  ;;  %v48_v3 = vld [vmem:[#allocation5 + $0x8] sm:$0xff]  ;;  %v49_v4 = vld [vmem:[#allocation5 + $0x10] sm:$0xff]  ;;  %v50_v6 = vld [vmem:[#allocation5 + $0x18] sm:$0xff]  ;;  %s485_s17 = smov [#allocation7]  }
  0x28   :  { %310 = vmatprep.mubr.msk.f32.mxu0 %vm483_vm0, %v484_v1  ;;  %345 = vmatprep.mubr.msk.f32.mxu1 %vm483_vm0, %v484_v1  ;;  %v349_v5 = vpack.c.bf16 %v48_v3, %v47_v2  ;;  %v352_v7 = vpack.c.bf16 %v50_v6, %v49_v4  ;;  %v51_v8 = vld [vmem:[#allocation5 + $0x20] sm:$0xff]  ;;  %v52_v9 = vld [vmem:[#allocation5 + $0x28] sm:$0xff]  ;;  %v53_v11 = vld [vmem:[#allocation5 + $0x30] sm:$0xff]  ;;  %s232_s18 = sshll.u32 %s485_s17, 4  ;;  %s233_s18 = int_to_ptr.vmem [resolvable:$true] %s232_s18 }
  0x29   :  { %v355_v10 = vpack.c.bf16 %v52_v9, %v51_v8  ;;  %v54_v12 = vld [vmem:[#allocation5 + $0x38] sm:$0xff]  ;;  %v55_v14 = vld [vmem:[#allocation5 + $0x40] sm:$0xff]  ;;  %v56_v15 = vld [vmem:[#allocation5 + $0x48] sm:$0xff]  ;;  %s450_s19 = scalar_lea.vmem %s233_s18, 64  ;;  %p455_p3 = scmp.lt.s32.totalorder %s233_s18, %s233_s18 }
  0x2a   :  { %350 = vmatpush3.bf16.msra.mxu0 %v349_v5  ;;  %374 = vmatpush3.bf16.msra.mxu1 %v349_v5  ;;  %v358_v13 = vpack.c.bf16 %v54_v12, %v53_v11  ;;  %v361_v16 = vpack.c.bf16 %v56_v15, %v55_v14  ;;  %v57_v17 = vld [vmem:[#allocation5 + $0x50] sm:$0xff]  ;;  %v58_v18 = vld [vmem:[#allocation5 + $0x58] sm:$0xff]  ;;  %v59_v20 = vld [vmem:[#allocation5 + $0x60] sm:$0xff]  ;;  %p451_p2 = scmp.ne.s32.totalorder %s233_s18, %s450_s19  ;;  %p456_p4 = scmp.lt.s32.totalorder %s450_s19, %s450_s19 }
  0x2b   :  { %351 = vmatprep.subr.bf16.mxu0 %v482_v0  ;;  %375 = vmatprep.subr.bf16.mxu1 %v482_v0  ;;  %v364_v19 = vpack.c.bf16 %v58_v18, %v57_v17  ;;  %v60_v21 = vld [vmem:[#allocation5 + $0x68] sm:$0xff]  ;;  %v61_v23 = vld [vmem:[#allocation5 + $0x70] sm:$0xff]  ;;  %v62_v24 = vld [vmem:[#allocation5 + $0x78] sm:$0xff] }
  0x2c   :  { %v367_v22 = vpack.c.bf16 %v60_v21, %v59_v20  ;;  %v370_v25 = vpack.c.bf16 %v62_v24, %v61_v23  ;;  %v44_v26 = vld [vmem:[#allocation2] sm:$0xf]  ;;  %p457_p5 = por %p456_p4, %p455_p3 }
  0x2d   :  { %v133_v27 = vmul.f32 %v44_v26, %v44_v26  ;;  %v242_v38 = vld [vmem:[%s561_s1] ss:$0 sm:$0xff] }
  0x2e   :  { %353 = vmatpush3.bf16.msra.mxu0 %v352_v7  ;;  %377 = vmatpush3.bf16.msra.mxu1 %v352_v7  ;;  %v243_v40 = vld [vmem:[%s562_s2] ss:$0 sm:$0xff]  ;;  %p458_p6 = pnand %p457_p5, %p451_p2 }
  0x2f   :  { %354 = vmatprep.subr.bf16.mxu0 %v482_v0  ;;  %378 = vmatprep.subr.bf16.mxu1 %v482_v0 }
  0x32   :  { %356 = vmatpush3.bf16.msra.mxu0 %v355_v10  ;;  %380 = vmatpush3.bf16.msra.mxu1 %v355_v10 }
  0x33   :  { %357 = vmatprep.subr.bf16.mxu0 %v482_v0  ;;  %381 = vmatprep.subr.bf16.mxu1 %v482_v0 }
  0x36   :  { %359 = vmatpush3.bf16.msra.mxu0 %v358_v13  ;;  %383 = vmatpush3.bf16.msra.mxu1 %v358_v13 }
  0x37   :  { %360 = vmatprep.subr.bf16.mxu0 %v482_v0  ;;  %384 = vmatprep.subr.bf16.mxu1 %v482_v0 }
  0x3a   :  { %362 = vmatpush3.bf16.msra.mxu0 %v361_v16  ;;  %386 = vmatpush3.bf16.msra.mxu1 %v361_v16 }
  0x3b   :  { %363 = vmatprep.subr.bf16.mxu0 %v482_v0  ;;  %387 = vmatprep.subr.bf16.mxu1 %v482_v0 }
  0x3e   :  { %365 = vmatpush3.bf16.msra.mxu0 %v364_v19  ;;  %389 = vmatpush3.bf16.msra.mxu1 %v364_v19 }
  0x3f   :  { %366 = vmatprep.subr.bf16.mxu0 %v482_v0  ;;  %390 = vmatprep.subr.bf16.mxu1 %v482_v0 }
  0x42   :  { %368 = vmatpush3.bf16.msra.mxu0 %v367_v22  ;;  %392 = vmatpush3.bf16.msra.mxu1 %v367_v22 }
  0x43   :  { %369 = vmatprep.subr.bf16.mxu0 %v482_v0  ;;  %393 = vmatprep.subr.bf16.mxu1 %v482_v0 }
  0x46   :  { %371 = vmatpush3.bf16.msra.mxu0 %v370_v25  ;;  %395 = vmatpush3.bf16.msra.mxu1 %v370_v25 }
  0x49   :  { %311 = vmatmul.mubr.f32.vlgmr.msra.gmra.mrb[0].mxu0 %v44_v26  ;;  %346 = vmatmul.mubr.f32.vlgmr.msra.gmra.mrb[0].mxu1 %v133_v27 }
 0x11c   :  { %v129_v28 = vpop.f32.mrb[0].mxu0  ;;  %v200_v29 = vpop.f32.mrb[0].mxu1 }
 0x11d   :  { %v204_v30 = vmul.f32 %v129_v28, %v129_v28  ;;  %v312_v31 = vpop.f32.mrb[1].mxu0  ;;  %v347_v32 = vpop.f32.mrb[1].mxu1  ;;  %v209_v36 = vsub.f32 %v44_v26, %v129_v28 }
 0x11f   :  { %v205_v33 = vsub.f32 %v200_v29, %v204_v30 }
 0x121   :  { %v206_v34 = vmax.f32 %v205_v33, 0.0 }
 0x123   :  { %v207_v35 = vadd.f32 1e-05, %v206_v34 }
 0x125   :  { %404 = vrsqrt.f32 %v207_v35 }
 0x12f   :  { %v405_v37 = vpop.eup %404 }
 0x130   :  { %v210_v39 = vmul.f32 %v405_v37, %v209_v36 }
 0x132   :  { %v217_v41 = vmul.f32 %v242_v38, %v210_v39 }
 0x134   :  { %v224_v42 = vadd.f32 %v243_v40, %v217_v41 }
 0x136   :  { %225 = vst [vmem:[#allocation7] sm:$0xf] %v224_v42 }
 0x137   :  { %461 = shalt.err (!%p458_p6)
}
 0x138   :  { %s462_s21 = scalar_lea.hbm %s564_s4, 64 }
 0x139   :  { %p463_p7 = scmp.ne.s32.totalorder %s564_s4, %s462_s21  ;;  %p466_p8 = scmp.lt.u32.totalorder %s462_s21, %s564_s4 }
 0x13b   :  { %p468_p9 = pnand %p466_p8, %p463_p7 }
 0x13d   :  { %471 = shalt.err (!%p468_p9)
}
 0x13e   :  { %235 = dma.vmem_to_hbm [thread:$0]  %s233_s18, 64, %s564_s4, [#allocation4]  }
 0x13f   :  { %476 = dma.done.wait [#allocation4], 64  }
 0x140   :  { %477 = vsyncadd [#allocation4], 4294967232 }
 0x141   :  { %239 = vsyncpa [#allocation3], 1 }
 0x142   :  { %240 = vsyncpa [#allocation6], 1 }
 0x143   :  { %241 = vsyncpa [#allocation4], 1 }

</bundles_post_ra>
